<compile_context>
chip_gen: v6e
topology: v6e:2x2x1
jax: 0.10.0
libtpu: 0.0.40
codegen_flags: <defaults>
</compile_context>

<pallas_src>
import jax
import jax.numpy as jnp
from jax import lax
from jax.experimental import pallas as pl
from jax.experimental.pallas import tpu as pltpu


def _build_channel_kernel(y_kernel):
    """(C, K) raw parameter -> (C, 2K-1) normalized symmetric 1-D kernel.

    Mirrors: abs -> cumsum -> concat(flip[1:]) -> normalize (sum + 1e-8).
    """
    yk = jnp.abs(y_kernel.astype(jnp.float32))
    yk = jnp.cumsum(yk, axis=1)
    yk_flip = yk[:, ::-1][:, 1:]
    w = jnp.concatenate([yk, yk_flip], axis=1)
    w = w / (jnp.sum(w, axis=1, keepdims=True) + 1e-8)
    return w


def _reflect_conv_matrix(w, n, pad):
    """Banded (C, n, n) matrix = reflection-pad(pad) + cross-correlation with w.

    M[c, i, j] = sum_t w[c, t] * [ reflect(i + t - pad) == j ]
    (reflection excludes the edge, matching nn.ReflectionPad2d / F.conv2d order).
    """
    _, L = w.shape
    i = jnp.arange(n)[:, None]            # (n, 1)
    t = jnp.arange(L)[None, :]            # (1, L)
    j = i + t - pad                       # (n, L), in [-pad, n-1+pad]
    j = jnp.where(j < 0, -j, j)
    j = jnp.where(j >= n, 2 * (n - 1) - j, j)
    onehot = jax.nn.one_hot(j, n, dtype=jnp.float32)      # (n, L, n)
    return jnp.einsum('cl,nlm->cnm', w, onehot)           # (C, n, n)


def _asf_kernel(a_ref, bt_ref, x_ref, o_ref):
    # Blocks: a_ref (1,H,H), bt_ref (1,W,W), x_ref (1,1,H,W), o_ref (1,1,H,W).
    x = x_ref[0, 0, :, :].astype(jnp.float32)            # (H, W)
    a = a_ref[0, :, :]                                    # (H, H)
    bt = bt_ref[0, :, :]                                  # (W, W)
    tmp = jnp.dot(a, x, preferred_element_type=jnp.float32)    # H-direction conv
    out = jnp.dot(tmp, bt, preferred_element_type=jnp.float32)  # W-direction conv
    o_ref[0, 0, :, :] = out.astype(o_ref.dtype)


def asf_conv(x, y_kernel, ksize):
    """x: (B, C, H, W), y_kernel: (C, K) (== PyTorch yKernel[:, 0, :, 0])."""
    B, C, H, W = x.shape
    pad = ksize - 1
    assert pad < H and pad < W, "reflection pad must be smaller than spatial dims"

    w = _build_channel_kernel(y_kernel)                           # (C, 2K-1)
    A = _reflect_conv_matrix(w, H, pad)                           # (C, H, H)
    Bt = jnp.swapaxes(_reflect_conv_matrix(w, W, pad), 1, 2)      # (C, W, W), pre-transposed

    flops = 2 * B * C * (H * H * W + H * W * W)
    bytes_accessed = (2 * x.size * x.dtype.itemsize
                      + A.size * 4 + Bt.size * 4)
    cost = pl.CostEstimate(flops=flops, transcendentals=0,
                           bytes_accessed=bytes_accessed)

    return pl.pallas_call(
        _asf_kernel,
        out_shape=jax.ShapeDtypeStruct((B, C, H, W), x.dtype),
        grid_spec=pltpu.PrefetchScalarGridSpec(
            num_scalar_prefetch=0,
            # c outer / b inner: per-channel operator blocks keep the same block
            # index across the inner axis, so they are not re-fetched per batch.
            grid=(C, B),
            in_specs=[
                pl.BlockSpec((1, H, H), lambda c, b: (c, 0, 0)),
                pl.BlockSpec((1, W, W), lambda c, b: (c, 0, 0)),
                pl.BlockSpec((1, 1, H, W), lambda c, b: (b, c, 0, 0)),
            ],
            out_specs=pl.BlockSpec((1, 1, H, W), lambda c, b: (b, c, 0, 0)),
        ),
        compiler_params=pltpu.CompilerParams(
            dimension_semantics=("parallel", "parallel"),
        ),
        cost_estimate=cost,
    )(A, Bt, x)


def asf_conv_ref(x, y_kernel, ksize):
    """Pure-JAX reference following the PyTorch forward step by step."""
    pad = ksize - 1
    L = 2 * ksize - 1
    B, C, H, W = x.shape
    w = _build_channel_kernel(y_kernel)                           # (C, L)
    xpad = jnp.pad(x.astype(jnp.float32),
                   ((0, 0), (0, 0), (pad, pad), (pad, pad)), mode='reflect')
    tmp = jnp.zeros((B, C, H, W + 2 * pad), jnp.float32)
    for t in range(L):                                            # conv over H
        tmp = tmp + w[None, :, t, None, None] * xpad[:, :, t:t + H, :]
    out = jnp.zeros((B, C, H, W), jnp.float32)
    for t in range(L):                                            # conv over W
        out = out + w[None, :, t, None, None] * tmp[:, :, :, t:t + W]
    return out.astype(x.dtype)


if __name__ == "__main__":
    key = jax.random.PRNGKey(0)
    kx, kk = jax.random.split(key)

    Ksize, C = 3, 4
    x = jax.random.normal(kx, (2, C, 16, 16), dtype=jnp.float32)
    # Module initializes yKernel to ones; perturb so cumsum/normalize is exercised.
    y_kernel = jnp.ones((C, Ksize), jnp.float32) \
        + 0.1 * jax.random.normal(kk, (C, Ksize), dtype=jnp.float32)

    out = asf_conv(x, y_kernel, Ksize)
    out = jax.block_until_ready(out)

    ref = asf_conv_ref(x, y_kernel, Ksize)
    assert out.shape == (2, C, 16, 16), out.shape
    # Tolerance covers possible reduced-precision MXU pass modes for f32 matmul;
    # any structural bug (wrong reflection index / normalization) is O(0.1-1).
    max_err = jnp.max(jnp.abs(out - ref))
    assert jnp.allclose(out, ref, rtol=2e-2, atol=2e-2), float(max_err)
    print("KERNEL_OK")
</pallas_src>

<mosaic_0001>
module attributes {stable_mosaic.version = 11 : i64} {
  func.func @_asf_kernel(%arg0: i32, %arg1: i32, %arg2: memref<1x16x16xf32, #tpu.memory_space<vmem>>, %arg3: memref<1x16x16xf32, #tpu.memory_space<vmem>>, %arg4: memref<1x1x16x16xf32, #tpu.memory_space<vmem>>, %arg5: memref<1x1x16x16xf32, #tpu.memory_space<vmem>>) attributes {dimension_semantics = [#tpu.dimension_semantics<parallel>, #tpu.dimension_semantics<parallel>], iteration_bounds = array<i64: 4, 2>, scalar_prefetch = 0 : i64, scratch_operands = 0 : i64, tpu.core_type = #tpu.core_type<tc>, window_params = [{transform_indices = @transform_0, window_bounds = array<i64: 1, 16, 16>}, {transform_indices = @transform_1, window_bounds = array<i64: 1, 16, 16>}, {transform_indices = @transform_2, window_bounds = array<i64: 1, 1, 16, 16>}, {transform_indices = @transform_3, window_bounds = array<i64: 1, 1, 16, 16>}]} {
    %c0 = arith.constant 0 : index
    %c0_0 = arith.constant 0 : index
    %c0_1 = arith.constant 0 : index
    %c0_2 = arith.constant 0 : index
    %0 = vector.load %arg4[%c0, %c0_0, %c0_1, %c0_2] : memref<1x1x16x16xf32, #tpu.memory_space<vmem>>, vector<1x1x16x16xf32>
    %1 = vector.shape_cast %0 : vector<1x1x16x16xf32> to vector<16x16xf32>
    %c0_3 = arith.constant 0 : index
    %c0_4 = arith.constant 0 : index
    %c0_5 = arith.constant 0 : index
    %2 = vector.load %arg2[%c0_3, %c0_4, %c0_5] : memref<1x16x16xf32, #tpu.memory_space<vmem>>, vector<1x16x16xf32>
    %3 = vector.shape_cast %2 : vector<1x16x16xf32> to vector<16x16xf32>
    %c0_6 = arith.constant 0 : index
    %c0_7 = arith.constant 0 : index
    %c0_8 = arith.constant 0 : index
    %4 = vector.load %arg3[%c0_6, %c0_7, %c0_8] : memref<1x16x16xf32, #tpu.memory_space<vmem>>, vector<1x16x16xf32>
    %5 = vector.shape_cast %4 : vector<1x16x16xf32> to vector<16x16xf32>
    %cst = arith.constant dense<0.000000e+00> : vector<16x16xf32>
    %6 = tpu.matmul %3, %1, %cst {dimension_numbers = #tpu.dot_dimension_numbers<[1], [0], [0], [1], [0, 0, 1, 1], [], []>} : vector<16x16xf32>, vector<16x16xf32>, vector<16x16xf32> -> vector<16x16xf32>
    %cst_9 = arith.constant dense<0.000000e+00> : vector<16x16xf32>
    %7 = tpu.matmul %6, %5, %cst_9 {dimension_numbers = #tpu.dot_dimension_numbers<[1], [0], [0], [1], [0, 0, 1, 1], [], []>} : vector<16x16xf32>, vector<16x16xf32>, vector<16x16xf32> -> vector<16x16xf32>
    %c0_10 = arith.constant 0 : index
    %c0_11 = arith.constant 0 : index
    %c0_12 = arith.constant 0 : index
    %c0_13 = arith.constant 0 : index
    %8 = vector.load %arg5[%c0_10, %c0_11, %c0_12, %c0_13] : memref<1x1x16x16xf32, #tpu.memory_space<vmem>>, vector<1x1x16x16xf32>
    %9 = vector.shape_cast %8 : vector<1x1x16x16xf32> to vector<16x16xf32>
    %10 = vector.shape_cast %7 : vector<16x16xf32> to vector<1x1x16x16xf32>
    tpu.vector_store %arg5[%c0_10, %c0_11, %c0_12, %c0_13], %10 {strides = array<i32>} : memref<1x1x16x16xf32, #tpu.memory_space<vmem>>, vector<1x1x16x16xf32>,
    return
  }
  func.func @transform_0(%arg0: i32, %arg1: i32) -> (i32, i32, i32) {
    %c0_i32 = arith.constant 0 : i32
    %c0_i32_0 = arith.constant 0 : i32
    %c0_i32_1 = arith.constant 0 : i32
    return %arg0, %c0_i32, %c0_i32_0 : i32, i32, i32
  }
  func.func @transform_1(%arg0: i32, %arg1: i32) -> (i32, i32, i32) {
    %c0_i32 = arith.constant 0 : i32
    %c0_i32_0 = arith.constant 0 : i32
    %c0_i32_1 = arith.constant 0 : i32
    return %arg0, %c0_i32, %c0_i32_0 : i32, i32, i32
  }
  func.func @transform_2(%arg0: i32, %arg1: i32) -> (i32, i32, i32, i32) {
    %c0_i32 = arith.constant 0 : i32
    %c0_i32_0 = arith.constant 0 : i32
    %c0_i32_1 = arith.constant 0 : i32
    return %arg1, %arg0, %c0_i32, %c0_i32_0 : i32, i32, i32, i32
  }
  func.func @transform_3(%arg0: i32, %arg1: i32) -> (i32, i32, i32, i32) {
    %c0_i32 = arith.constant 0 : i32
    %c0_i32_0 = arith.constant 0 : i32
    %c0_i32_1 = arith.constant 0 : i32
    return %arg1, %arg0, %c0_i32, %c0_i32_0 : i32, i32, i32, i32
  }
}

</mosaic_0001>

<bundles_post_ra>
// kernel: tpu_custom_call.1
= control target key start
LH: loop header
LB: loop body
LE: loop exit
PB: predicated region body
PF: predicated region fallthrough
CT: control target
= control target key end

     0   :  { %s1314_s0 = inlined_call_operand.hbm [shape: f32[4,16,16], index: 0, kind: input, shape index: {}]   ;;  %s1315_s1 = inlined_call_operand.hbm [shape: f32[4,16,16], index: 1, kind: input, shape index: {}]   ;;  %s1316_s2 = inlined_call_operand.hbm [shape: f32[2,4,16,16], index: 2, kind: input, shape index: {}]   ;;  %s1317_s3 = inlined_call_operand.hbm [shape: f32[2,4,16,16], index: 3, kind: output, shape index: {}]  }
   0x1   :  { %1329 = sst [smem:[#allocation20_spill]] %s1314_s0 }
   0x2   :  { %1330 = sst [smem:[#allocation21_spill]] %s1315_s1 }
   0x3   :  { %1331 = sst [smem:[#allocation22_spill]] %s1317_s3 }
   0x4   :  { %8 = vsyncpa [#allocation3], 0 }
   0x5   :  { %10 = vsyncpa [#allocation3 + $0x1], 0 }
   0x6   :  { %11 = vsyncpa [#allocation6], 0 }
   0x7   :  { %13 = vsyncpa [#allocation6 + $0x1], 0 }
   0x8   :  { %14 = vsyncpa [#allocation4], 0 }
   0x9   :  { %16 = vsyncpa [#allocation4 + $0x1], 0  ;;  %s1015_s12 = smov 0   ;;  %s1017_s13 = smov 0  }
   0xa   :  { %s1019_s14 = smov 0   ;;  %s1021_s15 = smov 0  }
   0xb   :  { %s1023_s16 = smov 0   ;;  %s1025_s17 = smov 0  }
   0xc   :  { %s1027_s18 = smov 0   ;;  %s1029_s19 = smov 0  }
   0xd   :  { %s1031_s20 = smov 0   ;;  %s1033_s21 = smov 0  }
   0xe   :  { %s1035_s22 = smov 0  }
   0xf LB: > { %1332 = sst [smem:[#allocation13_spill]] %s945_s12  ;;  %s1069_s23 = sadd.s32 4294967295, %s985_s22   ;;  %s985_s22 = sphi %s1035_s22, %s22_s22   ;;  %s981_s21 = sphi %s1033_s21, %s1371_s21   ;;  %s977_s20 = sphi %s1031_s20, %s1370_s20   ;;  %s973_s19 = sphi %s1029_s19, %s1369_s19   ;;  %s969_s18 = sphi %s1027_s18, %s1368_s18   ;;  %s965_s17 = sphi %s1025_s17, %s1367_s17   ;;  %s961_s16 = sphi %s1023_s16, %s1366_s16   ;;  %s957_s15 = sphi %s1021_s15, %s1365_s15   ;;  %s953_s14 = sphi %s1019_s14, %s1364_s14   ;;  %s949_s13 = sphi %s1017_s13, %s1363_s13   ;;  %s945_s12 = sphi %s1015_s12, %s1362_s12  }
  0x10   : > { %1333 = sst [smem:[#allocation14_spill]] %s969_s18  ;;  %p48_p0 = scmp.ne.s32.totalorder %s965_s17, %s961_s16 }
  0x11   : > { %1334 = sst [smem:[#allocation15_spill]] %s973_s19  ;;  %p49_p1 = scmp.eq.s32.totalorder %s985_s22, 0 }
  0x12   : > { %p54_p2 = scmp.ne.s32.totalorder %s961_s16, %s957_s15  ;;  %p55_p3 = scmp.eq.s32.totalorder %s1069_s23, 0 }
  0x13   : > { %p50_p4 = por %p49_p1, %p48_p0  ;;  %p1318_p5 = scmp.lt.s32.totalorder %s985_s22, 8 }
  0x14   : > { %p1083_p6 = por %p55_p3, %p54_p2  ;;  %s160_s27 = sand.u32 1, %s965_s17  }
  0x15   : > { %s1090_s28 = sshll.u32 %s160_s27, 4  ;;  %s633_s29 = sshll.u32 %s981_s21, 8 }
  0x16   : > { %p1095_p7 = pnand %p1318_p5, %p50_p4  ;;  %s181_s4 = sand.u32 1, %s985_s22  }
  0x17   : > { %s1337_s1 = sld [smem:[#allocation21_spill]]  ;;  %s185_s8 = scalar_lea.vmem [#allocation5], %s1090_s28 }
  0x18   : > { %s192_s9 = sshll.u32 %s185_s8, 4  ;;  %p618_p8 = scmp.ge.s32.totalorder %s985_s22, 1  ;;  %s193_s9 = int_to_ptr.vmem [resolvable:$true] %s192_s9 }
  0x19   : > { %p223_p9 = scmp.lt.s32.totalorder %s985_s22, 9  ;;  %s1108_s10 = scalar_lea.sflag [#allocation6], %s181_s4 }
  0x1a   : > { %p775_p10 = pneg %p1095_p7  ;;  %s786_s11 = scalar_lea.vmem %s193_s9, 256 }
  0x1b   : > { %p787_p11 = scmp.ne.s32.totalorder %s193_s9, %s786_s11  ;;  %s987_s15 = smov [#allocation5]  }
  0x1c   : > { %s791_s25 = sshll.u32 %s987_s15, 4  ;;  %s792_s25 = int_to_ptr.vmem [resolvable:$false] %s791_s25 }
  0x1d   : > { %s191_s7 = scalar_lea.hbm %s1337_s1, %s633_s29  ;;  %p789_p12 = pnand %p787_p11, %p775_p10 }
  0x1e   : > { %s793_s5 = scalar_lea.vmem %s792_s25, 512  ;;  %p794_p0 = scmp.lt.s32.totalorder %s193_s9, %s792_s25 }
  0x1f   : > { %p790_p13 = pneg %p789_p12  ;;  %p795_p2 = scmp.lt.s32.totalorder %s793_s5, %s786_s11 }
  0x21   : > { %p796_p4 = por %p795_p2, %p794_p0 }
  0x23   : > { %p797_p5 = pnand %p796_p4, %p790_p13 }
  0x25   : > { %800 = shalt.err (!%p797_p5)
}
  0x26   : > { %s1320_s6 = smov 128   ;;  %s1322_s4 = smov 8  }
  0x27   : > { %671 = dma.hbm_to_vmem [thread:$0]  (!%p1095_p7), %s191_s7, 256, %s193_s9, %s1108_s10, %s1320_s6, %s1320_s6, %s1322_s4  }
  0x28   : > { %p1125_p11 = pnand %p618_p8, %p223_p9  ;;  %s1339_s0 = sld [smem:[#allocation20_spill]] }
  0x29   : > { %s164_s5 = scalar_lea.vmem [#allocation2], %s1090_s28  ;;  %s161_s1 = scalar_lea.sflag [#allocation3], %s160_s27 }
  0x2a   : > { %s171_s24 = sshll.u32 %s164_s5, 4  ;;  %s990_s7 = smov [#allocation2]   ;;  %s172_s24 = int_to_ptr.vmem [resolvable:$true] %s171_s24 }
  0x2b   : > { %s814_s3 = scalar_lea.vmem %s172_s24, 256  ;;  %s819_s9 = sshll.u32 %s990_s7, 4  ;;  %s820_s9 = int_to_ptr.vmem [resolvable:$false] %s819_s9 }
  0x2c   : > { %p815_p5 = scmp.ne.s32.totalorder %s172_s24, %s814_s3  ;;  %s821_s6 = scalar_lea.vmem %s820_s9, 512 }
  0x2d   : > { %p822_p8 = scmp.lt.s32.totalorder %s172_s24, %s820_s9  ;;  %p823_p9 = scmp.lt.s32.totalorder %s821_s6, %s814_s3 }
  0x2e   : > { %s170_s15 = scalar_lea.hbm %s1339_s0, %s633_s29  ;;  %p817_p12 = pnand %p815_p5, %p775_p10 }
  0x2f   : > { %p824_p0 = por %p823_p9, %p822_p8 }
  0x30   : > { %p818_p13 = pneg %p817_p12 }
  0x32   : > { %p825_p2 = pnand %p824_p0, %p818_p13 }
  0x34   : > { %828 = shalt.err (!%p825_p2)
}
  0x35   : > { %s1340_s28 = smov 128   ;;  %s605_s3 = sadd.s32 4294967294, %s985_s22  }
  0x36   : > { %668 = dma.hbm_to_vmem [thread:$0]  (!%p1095_p7), %s170_s15, 256, %s172_s24, %s161_s1, %s1340_s28, %s1340_s28, %s1322_s4  }
  0x37   : > { %s31_s27 = sadd.s32 1, %s977_s20  ;;  %s95_s29 = sadd.s32 1, %s953_s14 }
  0x38   : > { %p32_p10 = scmp.ge.s32.totalorder %s31_s27, 2  ;;  %p102_p4 = scmp.ne.s32.totalorder %s953_s14, %s949_s13 }
  0x39   : > { %p108_p5 = scmp.ne.s32.totalorder %s949_s13, %s945_s12  ;;  %s1342_s30 = sadd.s32 1, %s981_s21 }
  0x3a   : > { %s1373_s27 = smov (%p32_p10, %s31_s27), 0  ;;  %s1375_s30 = smov (!%p32_p10, %s1342_s30), %s981_s21 }
  0x3b   : > { %1341 = sst [smem:[#allocation16_spill]] %s1373_s27  ;;  %s90_s6 = ssub.s32 %s977_s20, %s1373_s27 }
  0x3c   : > { %p1161_p12 = por %p102_p4, %p49_p1  ;;  %p36_p7 = scmp.ge.s32.totalorder %s1375_s30, 4 }
  0x3d   : > { %p1167_p13 = por %p108_p5, %p55_p3  ;;  %p134_p8 = scmp.eq.s32.totalorder %s1069_s23, 7 }
  0x3e   : > { %p140_p9 = scmp.eq.s32.totalorder %s605_s3, 7  ;;  %s1377_s30 = smov (%p36_p7, %s1375_s30), 0 }
  0x3f   : > { %1345 = sst [smem:[#allocation17_spill]] %s1377_s30  ;;  %p1174_p0 = por %p134_p8, %p102_p4 }
  0x40   : > { %p1178_p1 = por %p140_p9, %p108_p5  ;;  %s38_s15 = ssub.s32 %s981_s21, %s1377_s30 }
  0x41   : > { %s1346_s8 = scalar_select %p1174_p0, 1, 0 }
  0x42   : > { %s1348_s11 = scalar_select %p1178_p1, 1, 0 }
  0x43   : > { %1347 = sst [smem:[#allocation18_spill]] %s1346_s8  ;;  %s204_s5 = sand.u32 1, %s953_s14  }
  0x44   : > { %1349 = sst [smem:[#allocation19_spill]] %s1348_s11  ;;  %p39_p3 = scmp.eq.s32.totalorder %s38_s15, 0 }
  0x45   : > { %s92_s7 = sor.u32 %s90_s6, %s38_s15  ;;  %s614_s9 = sshll.u32 %s204_s5, 4 }
  0x46   : > { %p93_p2 = scmp.eq.s32.totalorder %s92_s7, 0  ;;  %s1350_s3 = sadd.s32 1, %s965_s17 }
  0x47   : > { %s1188_s4 = scalar_select %p39_p3, %s965_s17, %s1350_s3  }
  0x48   : > { %s1191_s0 = scalar_select %p93_p2, %s953_s14, %s95_s29  }
  0x49   : > { %s615_s27 = sshll.u32 %s981_s21, 1  ;;  %s616_s12 = sshll.u32 %s977_s20, 3 }
  0x4a   : > { %s206_s8 = scalar_lea.vmem [#allocation7], %s614_s9  ;;  %s212_s19 = sadd.s32 %s616_s12, %s615_s27 }
  0x4b   : > { %s215_s18 = sshll.u32 %s206_s8, 4  ;;  %s617_s11 = sshll.u32 %s212_s19, 7  ;;  %s216_s18 = int_to_ptr.vmem [resolvable:$true] %s215_s18 }
  0x4c   : > { %p1351_p10 = scmp.lt.s32.totalorder %s985_s22, 8  ;;  %s214_s5 = scalar_lea.hbm %s1316_s2, %s617_s11 }
  0x4d   : > { %s842_s29 = scalar_lea.vmem %s216_s18, 256  ;;  %s991_s12 = smov [#allocation7]  }
  0x4e   : > { %p1199_p4 = pnand %p1351_p10, %p1161_p12  ;;  %p843_p7 = scmp.ne.s32.totalorder %s216_s18, %s842_s29 }
  0x4f   : > { %s847_s27 = sshll.u32 %s991_s12, 4  ;;  %s848_s27 = int_to_ptr.vmem [resolvable:$false] %s847_s27 }
  0x50   : > { %p831_p5 = pneg %p1199_p4  ;;  %s849_s19 = scalar_lea.vmem %s848_s27, 512 }
  0x51   : > { %p850_p3 = scmp.lt.s32.totalorder %s216_s18, %s848_s27  ;;  %p851_p12 = scmp.lt.s32.totalorder %s849_s19, %s842_s29 }
  0x52   : > { %p845_p8 = pnand %p843_p7, %p831_p5 }
  0x53   : > { %p852_p2 = por %p851_p12, %p850_p3 }
  0x54   : > { %p846_p9 = pneg %p845_p8 }
  0x56   : > { %p853_p10 = pnand %p852_p2, %p846_p9 }
  0x58   : > { %856 = shalt.err (!%p853_p10)
}
  0x59   : > { %s1353_s1 = smov 8   ;;  %227 = sbr.rel (%p1125_p11) target bundleno = 512 (0x200), region = 32 }
  0x5a   : > { %674 = dma.hbm_to_vmem [thread:$0]  (!%p1199_p4), %s214_s5, 256, %s216_s18, %s1108_s10, %s1340_s28, %s1340_s28, %s1353_s1  }
  0x5b   : > { %s229_s8 = sand.u32 (!%p1125_p11), 1, %s961_s16  }
  0x5c   : > { %s1217_s11 = sshll.u32 (!%p1125_p11), %s229_s8, 4  ;;  %s230_s7 = scalar_lea.sflag (!%p1125_p11), [#allocation3], %s229_s8 }
  0x5d   : > { %s233_s9 = scalar_lea.vmem (!%p1125_p11), [#allocation2], %s1217_s11 }
  0x5e   : > { %928 = dma.done.wait (%p1083_p6), %s230_s7, 256  }
  0x5f   : > { %930 = vsyncadd (%p1083_p6), %s230_s7, 4294967040  ;;  %s238_s18 = sand.u32 1, %s1069_s23   ;;  %s242_s25 = scalar_lea.vmem [#allocation5], %s1217_s11 }
  0x60   : > { %s239_s10 = scalar_lea.sflag [#allocation6], %s238_s18 }
  0x61   : > { %932 = dma.done.wait (%p1083_p6), %s239_s10, 256  }
  0x62   : > { %934 = vsyncadd (%p1083_p6), %s239_s10, 4294967040  ;;  %s249_s28 = sand.u32 1, %s949_s13  }
  0x63   : > { %s621_s30 = sshll.u32 %s249_s28, 4 }
  0x64   : > { %s251_s3 = scalar_lea.vmem [#allocation7], %s621_s30 }
  0x65   : > { %936 = dma.done.wait (%p1167_p13), %s239_s10, 256  }
  0x66   : > { %938 = vsyncadd (%p1167_p13), %s239_s10, 4294967040  ;;  %vm290_vm0 = vcmask 130048   ;;  %v285_v0 = vld [vmem:[%s251_s3 + $0x8] sm:$0xff]  ;;  %v284_v1 = vld [vmem:[%s251_s3] sm:$0xff]  ;;  %s1354_s23 = sld [smem:[#allocation15_spill]]  ;;  %s283_s29 = scalar_lea.vmem [#allocation8], %s621_s30 }
  0x67   : > { %v286_v2 = vld [vmem:[%s233_s9] sm:$0xff]  ;;  %643 = vmatprep.subr.mxu0 %v285_v0  ;;  %s1355_s26 = sld [smem:[#allocation14_spill]]  ;;  %v287_v3 = vld [vmem:[%s233_s9 + $0x8] sm:$0xff]  ;;  %s471_s12 = sshll.u32 %s283_s29, 4  ;;  %s1243_s12 = int_to_ptr.vmem [resolvable:$true] %s471_s12 }
  0x68   : > { %647 = vmatprep.mubr.msk.f32.mxu0 %vm290_vm0, %v286_v2  ;;  %644 = vmatpush3.msra.mxu0 %v285_v0  ;;  %v289_v4 = vld [vmem:[%s242_s25 + $0x8] sm:$0xff]  ;;  %v288_v5 = vld [vmem:[%s242_s25] sm:$0xff]  ;;  %s1357_s8 = sld [smem:[#allocation22_spill]]  ;;  %s1254_s7 = scalar_lea.sflag [#allocation4], %s249_s28 }
  0x69   : > { %645 = vmatprep.subr.mxu0 %v284_v1  ;;  %650 = vmatprep.subr.mxu1 %v289_v4  ;;  %s857_s9 = scalar_lea.vmem %s1243_s12, 256  ;;  %s992_s18 = smov [#allocation8]  }
  0x6a   : > { %646 = vmatpush3.msra.mxu0 %v284_v1  ;;  %651 = vmatpush3.msra.mxu1 %v289_v4  ;;  %p858_p6 = scmp.ne.s32.totalorder %s1243_s12, %s857_s9  ;;  %s861_s10 = sshll.u32 %s992_s18, 4  ;;  %s862_s10 = int_to_ptr.vmem [resolvable:$false] %s861_s10 }
  0x6b   : > { %648 = vmatmul.mubr.msk.f32.vlgmr.msra.gmra.mxu0 %vm290_vm0, %v287_v3  ;;  %652 = vmatprep.subr.mxu1 %v288_v5  ;;  %s863_s25 = scalar_lea.vmem %s862_s10, 512  ;;  %p864_p4 = scmp.lt.s32.totalorder %s1243_s12, %s862_s10 }
  0x6c   : > { %653 = vmatpush3.msra.mxu1 %v288_v5  ;;  %s628_s6 = sshll.u32 %s1354_s23, 1  ;;  %p859_p11 = pnand %p858_p6, %p1174_p0 }
  0x6d   : > { %s629_s15 = sshll.u32 %s1355_s26, 3  ;;  %p865_p5 = scmp.lt.s32.totalorder %s863_s25, %s857_s9 }
  0x6e   : > { %s468_s5 = sadd.s32 %s629_s15, %s628_s6  ;;  %p860_p13 = pneg %p859_p11 }
  0x6f   : > { %s630_s27 = sshll.u32 %s468_s5, 7  ;;  %p866_p7 = por %p865_p5, %p864_p4 }
  0x70   : > { %s1248_s11 = scalar_lea.hbm %s1357_s8, %s630_s27 }
  0x71   : > { %p867_p8 = pnand %p866_p7, %p860_p13 }
 0x12b   : > { %v649_v6 = vpop.f32.mrf.mxu0 }
 0x12d   : > { %v363_v7 = vpop.f32.mrf.mxu0 }
 0x12e   : > { %654 = vmatprep.mubr.msk.f32.mxu1 %vm290_vm0, %v363_v7 }
 0x12f   : > { %655 = vmatmul.mubr.msk.f32.vlgmr.msra.gmra.mxu1 %vm290_vm0, %v649_v6 }
 0x1ef   : > { %v656_v8 = vpop.f32.mrf.mxu1 }
 0x1f0   : > { %454 = vst.msk [vmem:[%s283_s29 + $0x8] sm:$0xff] %vm290_vm0, %v656_v8 }
 0x1f1   : > { %v444_v9 = vpop.f32.mrf.mxu1 }
 0x1f2   : > { %453 = vst.msk [vmem:[%s283_s29] sm:$0xff] %vm290_vm0, %v444_v9 }
 0x1f3   : > { %870 = shalt.err (!%p867_p8)
}
 0x1f4   : > { %s871_s28 = scalar_lea.hbm %s1248_s11, 256  ;;  %s875_s23 = scalar_lea.hbm %s1357_s8, 2048 }
 0x1f5   : > { %p872_p9 = scmp.ne.s32.totalorder %s1248_s11, %s871_s28  ;;  %p876_p2 = scmp.lt.s32.totalorder %s1248_s11, %s1357_s8 }
 0x1f6   : > { %p877_p10 = scmp.lt.s32.totalorder %s875_s23, %s871_s28 }
 0x1f7   : > { %p873_p3 = pnand %p872_p9, %p1174_p0 }
 0x1f8   : > { %p878_p6 = por %p877_p10, %p876_p2 }
 0x1f9   : > { %p874_p12 = pneg %p873_p3 }
 0x1fb   : > { %p879_p11 = pnand %p878_p6, %p874_p12 }
 0x1fd   : > { %882 = shalt.err (!%p879_p11)
}
 0x1fe   : > { %s993_s15 = smov 128   ;;  %s994_s5 = smov 8  }
 0x1ff   : > { %663 = dma.vmem_to_hbm [thread:$0]  (%p1174_p0), %s1243_s12, 256, %s1248_s11, %s1254_s7, %s993_s15, %s993_s15, %s994_s5  }
 0x200 PF: > { %s1358_s29 = sld [smem:[#allocation13_spill]]  ;;  %p680_p13 = scmp.ge.s32.totalorder %s985_s22, 2 }
 0x202   : > { %p676_p4 = pnand %p680_p13, %p1178_p1 }
 0x204   : > { %p677_p5 = pneg %p676_p4 }
 0x206   : > { %s486_s19 = sand.u32 1, %s1358_s29  }
 0x207   : > { %s487_s1 = scalar_lea.sflag [#allocation4], %s486_s19 }
 0x208   : > { %940 = dma.done.wait (%p677_p5), %s487_s1, 256  }
 0x209   : > { %942 = vsyncadd (%p677_p5), %s487_s1, 4294967040  ;;  %s22_s22 = sadd.s32 1, %s985_s22   ;;  %s1360_s24 = sld [smem:[#allocation16_spill]] }
 0x20a   : > { %p19_p7 = scmp.ge.s32.totalorder %s22_s22, 10   ;;  %s1361_s11 = sld [smem:[#allocation17_spill]] }
 0x20b   : > { %s1362_s12 = smov %s949_s13  ;;  %s1363_s13 = smov %s953_s14 }
 0x20c   : > { %s1364_s14 = smov %s1191_s0  ;;  %s1365_s15 = smov %s961_s16 }
 0x20d   : > { %s1366_s16 = smov %s965_s17  ;;  %s1367_s17 = smov %s1188_s4 }
 0x20e   : > { %s1368_s18 = smov %s977_s20  ;;  %s1369_s19 = smov %s981_s21 }
 0x20f   : > { %s1370_s20 = smov %s1360_s24  ;;  %21 = sbr.rel (!%p19_p7) target bundleno = 15 (0xf), region = 101 }
 0x210   : > { %s1371_s21 = smov %s1361_s11 }
 0x214   :  { %492 = vsyncpa [#allocation3], 1 }
 0x215   :  { %494 = vsyncpa [#allocation3 + $0x1], 1 }
 0x216   :  { %495 = vsyncpa [#allocation6], 1 }
 0x217   :  { %497 = vsyncpa [#allocation6 + $0x1], 1 }
 0x218   :  { %498 = vsyncpa [#allocation4], 1 }
 0x219   :  { %500 = vsyncpa [#allocation4 + $0x1], 1 }

</bundles_post_ra>
